<compile_context>
chip_gen: v7x
topology: tpu7x:2x2x1
jax: 0.10.0
libtpu: 0.0.40
codegen_flags: <defaults>
</compile_context>

<pallas_src>
import functools
import numpy as np

import jax
import jax.numpy as jnp
from jax import lax
from jax.experimental import pallas as pl
from jax.experimental.pallas import tpu as pltpu


VMEM_LIMIT = 32 * 1024 * 1024  # v7x has 64 MiB VMEM; keep the scoped budget <= 32 MiB.


def _round_up(a, m):
    return (a + m - 1) // m * m


# --------------------------------------------------------------------- matmul kernels

def _mm_affine_kernel(x_ref, w_ref, s_ref, b_ref, o_ref, acc_ref, *, relu):
    """Tiled o = act((x @ w) * s + b); f32 accumulation across the K grid axis."""
    @pl.when(pl.program_id(2) == 0)
    def _init():
        acc_ref[...] = jnp.zeros_like(acc_ref)

    acc_ref[...] += jnp.dot(x_ref[...], w_ref[...],
                            preferred_element_type=jnp.float32)

    @pl.when(pl.program_id(2) == pl.num_programs(2) - 1)
    def _fin():
        y = acc_ref[...] * s_ref[...] + b_ref[...]
        if relu:
            y = jnp.maximum(y, 0.0)
        o_ref[...] = y.astype(o_ref.dtype)


def _mm_affine_res_kernel(x_ref, w_ref, s_ref, b_ref, r_ref, o_ref, acc_ref, *, relu):
    """Same as above with the bottleneck residual fused into the epilogue."""
    @pl.when(pl.program_id(2) == 0)
    def _init():
        acc_ref[...] = jnp.zeros_like(acc_ref)

    acc_ref[...] += jnp.dot(x_ref[...], w_ref[...],
                            preferred_element_type=jnp.float32)

    @pl.when(pl.program_id(2) == pl.num_programs(2) - 1)
    def _fin():
        y = acc_ref[...] * s_ref[...] + b_ref[...] + r_ref[...].astype(jnp.float32)
        if relu:
            y = jnp.maximum(y, 0.0)
        o_ref[...] = y.astype(o_ref.dtype)


def matmul_affine(x, wm, scale, bias, n_out, residual=None, relu=True,
                  out_dtype=jnp.bfloat16):
    """y[:M, :n_out] = act((x @ wm) * scale + bias (+ residual)).

    x: (M, K) bf16; wm: (K, Np) bf16 (pre-packed, N already lane-padded);
    scale/bias: (1, Np) f32; residual: (M, n_out) or None.
    """
    M, K = x.shape
    Kp, Np = wm.shape
    assert K == Kp, (K, Kp)

    # ---- K tiling (bf16-friendly, 256 preferred) ----
    if Kp <= 512:
        tk = Kp                      # single K step, full-dim block (no padding needed)
    else:
        new_kp = _round_up(Kp, 128)
        if new_kp != Kp:             # never triggered for ResNet-50 shapes
            x = jnp.pad(x, ((0, 0), (0, new_kp - Kp)))
            wm = jnp.pad(wm, ((0, new_kp - Kp), (0, 0)))
            Kp = new_kp
        tk = 256 if Kp % 256 == 0 else 128

    # ---- M tiling ----
    tm = min(512, _round_up(M, 16))
    Mp = _round_up(M, tm)
    if Mp != M:
        x = jnp.pad(x, ((0, Mp - M), (0, 0)))

    # ---- N tiling (256-wide tiles when possible to fill the 256x256 MXU) ----
    tn = 256 if Np % 256 == 0 else 128

    nm, nn, nk = Mp // tm, Np // tn, Kp // tk

    x_spec = pl.BlockSpec((tm, tk), lambda i, j, k: (i, k))
    w_spec = pl.BlockSpec((tk, tn), lambda i, j, k: (k, j))
    v_spec = pl.BlockSpec((1, tn), lambda i, j, k: (0, j))
    o_spec = pl.BlockSpec((tm, tn), lambda i, j, k: (i, j))
    cp = pltpu.CompilerParams(
        dimension_semantics=("parallel", "parallel", "arbitrary"),
        vmem_limit_bytes=VMEM_LIMIT)
    out_shape = jax.ShapeDtypeStruct((Mp, Np), out_dtype)
    scratch = [pltpu.VMEM((tm, tn), jnp.float32)]

    if residual is None:
        out = pl.pallas_call(
            functools.partial(_mm_affine_kernel, relu=relu),
            grid_spec=pltpu.PrefetchScalarGridSpec(
                num_scalar_prefetch=0, grid=(nm, nn, nk),
                in_specs=[x_spec, w_spec, v_spec, v_spec],
                out_specs=o_spec, scratch_shapes=scratch),
            out_shape=out_shape, compiler_params=cp,
        )(x, wm, scale, bias)
    else:
        r = residual.astype(jnp.bfloat16)
        if r.shape != (Mp, Np):
            r = jnp.pad(r, ((0, Mp - r.shape[0]), (0, Np - r.shape[1])))
        out = pl.pallas_call(
            functools.partial(_mm_affine_res_kernel, relu=relu),
            grid_spec=pltpu.PrefetchScalarGridSpec(
                num_scalar_prefetch=0, grid=(nm, nn, nk),
                in_specs=[x_spec, w_spec, v_spec, v_spec, o_spec],  # residual: (tm,tn) on (i,j)
                out_specs=o_spec, scratch_shapes=scratch),
            out_shape=out_shape, compiler_params=cp,
        )(x, wm, scale, bias, r)
    return out[:M, :n_out]


# --------------------------------------------- 3x3 stride-1 conv (no HBM im2col)

def _conv_s1_kernel(x_ref, w_ref, s_ref, b_ref, o_ref, acc_ref, *,
                    wp, kh, kw, cin, tm, relu):
    """Direct conv: accumulate kh*kw taps from the flattened padded NHWC image.

    x_ref: (1, FLAT, cin) -- full (spatially padded) image, flattened over (H, W).
    For tap (dh, dw) the input needed by flat output index n is flat index
    n + dh*wp + dw, so each tap is a shifted (tm, cin) slab feeding one MXU matmul.
    The shift is split into a 16-aligned dynamic part (ref load) and a <16 static
    residual (value slice) to keep loads tile-aligned.
    """
    base = pl.program_id(2) * tm          # flat output offset of this M tile
    t = 0
    for dh in range(kh):
        for dw in range(kw):
            off = dh * wp + dw
            a_off = (off // 16) * 16
            rem = off - a_off
            start = pl.multiple_of(base + a_off, 16)
            wide = x_ref[0, pl.ds(start, tm + 16), :]         # (tm + 16, cin)
            lhs = wide[rem:rem + tm, :]                        # static sub-tile shift
            contrib = jnp.dot(lhs, w_ref[pl.ds(t * cin, cin), :],
                              preferred_element_type=jnp.float32)
            if t == 0:
                acc_ref[...] = contrib
            else:
                acc_ref[...] += contrib
            t += 1
    y = acc_ref[...] * s_ref[...] + b_ref[...]
    if relu:
        y = jnp.maximum(y, 0.0)
    o_ref[0] = y.astype(o_ref.dtype)


def conv_same_s1(x, p, relu=True):
    """KxK (odd), stride-1, 'same'-padded conv + folded BN (+ReLU).  x: NHWC bf16."""
    B, H, W, cin = x.shape
    kh, kw = p["ksize"]
    assert kh == kw and kh % 2 == 1
    pad = (kh - 1) // 2
    Ho, Wo = H, W
    Wp = W + 2 * pad
    Mvalid = Ho * Wp                       # "wide" output rows (garbage cols sliced later)

    # cap the per-tap (tm+16, cin) load at ~32 KiB to stay register/VMEM friendly
    tm_cap = max(16, (32768 // (2 * cin)) // 16 * 16)
    tm = min(256, tm_cap, _round_up(Mvalid, 16))
    Mp = _round_up(Mvalid, tm)

    max_off = (kh - 1) * Wp + (kw - 1)
    flat_needed = Mp + max_off + 32
    hp_nat = H + 2 * pad
    extra_h = max(0, -(-(flat_needed - hp_nat * Wp) // Wp))
    hp_ext = hp_nat + extra_h
    xp = jnp.pad(x, ((0, 0), (pad, pad + extra_h), (pad, pad), (0, 0)))
    xf = xp.reshape(B, hp_ext * Wp, cin)   # free collapse (NHWC is contiguous)

    Np = p["wm"].shape[1]
    tn = 256 if Np % 256 == 0 else 128
    nn, nm = Np // tn, Mp // tm

    kernel = functools.partial(_conv_s1_kernel, wp=Wp, kh=kh, kw=kw,
                               cin=cin, tm=tm, relu=relu)
    out = pl.pallas_call(
        kernel,
        grid_spec=pltpu.PrefetchScalarGridSpec(
            num_scalar_prefetch=0, grid=(B, nn, nm),
            in_specs=[pl.BlockSpec((1, hp_ext * Wp, cin), lambda b, j, i: (b, 0, 0)),
                      pl.BlockSpec((kh * kw * cin, tn), lambda b, j, i: (0, j)),
                      pl.BlockSpec((1, tn), lambda b, j, i: (0, j)),
                      pl.BlockSpec((1, tn), lambda b, j, i: (0, j))],
            out_specs=pl.BlockSpec((1, tm, tn), lambda b, j, i: (b, i, j)),
            scratch_shapes=[pltpu.VMEM((tm, tn), jnp.float32)]),
        out_shape=jax.ShapeDtypeStruct((B, Mp, Np), jnp.bfloat16),
        compiler_params=pltpu.CompilerParams(
            dimension_semantics=("parallel", "parallel", "parallel"),
            vmem_limit_bytes=VMEM_LIMIT),
    )(xf, p["wm"], p["scale"], p["bias"])

    out = out[:, :Mvalid, :p["n_out"]].reshape(B, Ho, Wp, p["n_out"])[:, :, :Wo, :]
    return out


# ---------------------------------------------------- strided spatial convs (fallback)

def _im2col_nhwc(x, kh, kw, stride, padding):
    """Lightweight NHWC patch extraction for the few strided spatial convs."""
    B, H, W, C = x.shape
    xp = jnp.pad(x, ((0, 0), (padding, padding), (padding, padding), (0, 0)))
    Ho = (H + 2 * padding - kh) // stride + 1
    Wo = (W + 2 * padding - kw) // stride + 1
    cols = []
    for dh in range(kh):
        for dw in range(kw):
            cols.append(xp[:, dh:dh + stride * Ho:stride, dw:dw + stride * Wo:stride, :])
    patches = jnp.concatenate(cols, axis=-1)          # (B, Ho, Wo, kh*kw*C)
    return patches.reshape(B * Ho * Wo, kh * kw * C), Ho, Wo


# ---------------------------------------------------------------------- conv dispatch

def conv_bn(x, p, *, stride, padding, relu=True, residual=None):
    """Conv2d(bias=False) + folded BN (+residual) (+ReLU).  x NHWC bf16, pre-packed p."""
    kh, kw = p["ksize"]
    if kh == 1 and kw == 1:
        if stride > 1:
            x = x[:, ::stride, ::stride, :]
        B, H, W, C = x.shape
        xm = x.reshape(B * H * W, C)
        rm = None
        if residual is not None:
            rm = residual.reshape(B * H * W, residual.shape[-1])
        y = matmul_affine(xm, p["wm"], p["scale"], p["bias"], p["n_out"],
                          residual=rm, relu=relu)
        return y.reshape(B, H, W, p["n_out"])

    if stride == 1:
        assert residual is None
        return conv_same_s1(x, p, relu=relu)

    # TODO(synk): 4 strided spatial convs (7x7 s2 stem, three 3x3 s2) still use a small
    # NHWC im2col feeding the tiled matmul; a phase-split (space-to-batch) Pallas path
    # would remove even this (tensors involved are tiny, so impact is negligible).
    assert residual is None
    B = x.shape[0]
    xm, Ho, Wo = _im2col_nhwc(x, kh, kw, stride, padding)
    y = matmul_affine(xm, p["wm"], p["scale"], p["bias"], p["n_out"], relu=relu)
    return y.reshape(B, Ho, Wo, p["n_out"])


# -------------------------------------------------- fused avgpool + embed Linear

def _pool_embed_kernel(x_ref, w_ref, b_ref, o_ref, *, inv_hw):
    feat = jnp.sum(x_ref[...].astype(jnp.float32), axis=1) * inv_hw     # (B, C)
    y = jnp.dot(feat.astype(jnp.bfloat16), w_ref[...],
                preferred_element_type=jnp.float32) + b_ref[...]
    o_ref[...] = y


def pool_embed(x, p):
    """AdaptiveAvgPool2d(1) + flatten + Linear fused in one small un-tiled kernel."""
    B, H, W, C = x.shape
    xf = x.reshape(B, H * W, C)
    np_out = p["wm"].shape[1]
    vmem = pl.BlockSpec(memory_space=pltpu.MemorySpace.VMEM)
    out = pl.pallas_call(
        functools.partial(_pool_embed_kernel, inv_hw=1.0 / float(H * W)),
        out_shape=jax.ShapeDtypeStruct((B, np_out), jnp.float32),
        in_specs=[vmem, vmem, vmem], out_specs=vmem,
        compiler_params=pltpu.CompilerParams(vmem_limit_bytes=VMEM_LIMIT),
    )(xf, p["wm"], p["bias"])
    return out[:, :p["n_out"]]


# -------------------------------------------------------------------------- parameters

def _conv_w(key, cout, cin, kh, kw):
    fan_in = cin * kh * kw
    return jax.random.normal(key, (cout, cin, kh, kw), jnp.float32) * np.sqrt(2.0 / fan_in)


def _bn_fold(cout):
    # frozen (eval-mode) BN: y = gamma*(x-mean)/sqrt(var+eps)+beta  ->  x*scale + bias
    eps = 1e-5
    gamma = jnp.ones((cout,), jnp.float32)
    beta = jnp.zeros((cout,), jnp.float32)
    mean = jnp.zeros((cout,), jnp.float32)
    var = jnp.ones((cout,), jnp.float32)
    scale = gamma / jnp.sqrt(var + eps)
    return scale, beta - mean * scale


def _pack_conv(w_oihw, scale, bias):
    """Pre-pack once: OIHW -> (kh*kw*Cin, Cout_padded) bf16, scale/bias -> (1, Np) f32."""
    cout, cin, kh, kw = w_oihw.shape
    k = kh * kw * cin
    np_out = _round_up(cout, 128)
    wm = jnp.transpose(w_oihw, (2, 3, 1, 0)).reshape(k, cout)
    wm = jnp.pad(wm, ((0, 0), (0, np_out - cout))).astype(jnp.bfloat16)
    s = jnp.pad(scale, (0, np_out - cout)).reshape(1, np_out).astype(jnp.float32)
    b = jnp.pad(bias, (0, np_out - cout)).reshape(1, np_out).astype(jnp.float32)
    return {"wm": wm, "scale": s, "bias": b, "n_out": int(cout),
            "ksize": (int(kh), int(kw))}


def _make_bottleneck(key, inplanes, planes, stride):
    k = jax.random.split(key, 4)
    p = {
        "conv1": _pack_conv(_conv_w(k[0], planes, inplanes, 1, 1), *_bn_fold(planes)),
        "conv2": _pack_conv(_conv_w(k[1], planes, planes, 3, 3), *_bn_fold(planes)),
        "conv3": _pack_conv(_conv_w(k[2], planes * 4, planes, 1, 1), *_bn_fold(planes * 4)),
        "stride": stride,
        "down": None,
    }
    if stride != 1 or inplanes != planes * 4:
        p["down"] = _pack_conv(_conv_w(k[3], planes * 4, inplanes, 1, 1),
                               *_bn_fold(planes * 4))
    return p


def make_encoder_params(key, embed_size):
    keys = iter(jax.random.split(key, 32))
    params = {"conv1": _pack_conv(_conv_w(next(keys), 64, 3, 7, 7), *_bn_fold(64))}
    cfg = [(64, 3, 1), (128, 4, 2), (256, 6, 2), (512, 3, 2)]      # resnet50 bottlenecks
    inplanes, layers = 64, []
    for planes, blocks, stride in cfg:
        blks = []
        for b in range(blocks):
            blks.append(_make_bottleneck(next(keys), inplanes, planes,
                                         stride if b == 0 else 1))
            inplanes = planes * 4
        layers.append(blks)
    params["layers"] = layers
    k1, k2 = jax.random.split(next(keys))
    bound = 1.0 / np.sqrt(2048.0)                                   # resnet.fc.in_features
    ew = jax.random.uniform(k1, (embed_size, 2048), jnp.float32, -bound, bound)
    eb = jax.random.uniform(k2, (embed_size,), jnp.float32, -bound, bound)
    np_out = _round_up(embed_size, 128)
    params["embed"] = {
        "wm": jnp.pad(ew.T, ((0, 0), (0, np_out - embed_size))).astype(jnp.bfloat16),
        "bias": jnp.pad(eb, (0, np_out - embed_size)).reshape(1, np_out).astype(jnp.float32),
        "n_out": int(embed_size),
    }
    return params


# ------------------------------------------------------------------------------ forward

def _bottleneck_forward(x, p):
    s = p["stride"]
    if p["down"] is not None:
        identity = conv_bn(x, p["down"], stride=s, padding=0, relu=False)
    else:
        identity = x
    out = conv_bn(x, p["conv1"], stride=1, padding=0, relu=True)
    out = conv_bn(out, p["conv2"], stride=s, padding=1, relu=True)
    out = conv_bn(out, p["conv3"], stride=1, padding=0, relu=True, residual=identity)
    return out


def encoder_cnn_forward(params, images):
    """images: (B, 3, H, W) NCHW f32 -> features: (B, embed_size) f32."""
    x = jnp.transpose(images, (0, 2, 3, 1)).astype(jnp.bfloat16)    # NCHW -> NHWC once
    x = conv_bn(x, params["conv1"], stride=2, padding=3, relu=True)
    # TODO(synk): MaxPool2d(3, stride=2, padding=1) kept as XLA glue (cheap window max).
    x = lax.reduce_window(x, jnp.array(-jnp.inf, x.dtype), lax.max,
                          window_dimensions=(1, 3, 3, 1),
                          window_strides=(1, 2, 2, 1),
                          padding=((0, 0), (1, 1), (1, 1), (0, 0)))
    for blocks in params["layers"]:
        for blk in blocks:
            x = _bottleneck_forward(x, blk)
    return pool_embed(x, params["embed"])                           # fused avgpool + Linear


# --------------------------------------------------------------------------------- main

if __name__ == "__main__":
    key = jax.random.PRNGKey(0)
    kparam, kx = jax.random.split(key)
    embed_size = 32                         # EncoderCNN(input_size=32)
    params = make_encoder_params(kparam, embed_size)
    images = jax.random.normal(kx, (2, 3, 32, 32), jnp.float32)     # small NCHW batch

    feats = encoder_cnn_forward(params, images)
    feats = jax.block_until_ready(feats)

    assert feats.shape == (2, embed_size), feats.shape
    assert bool(jnp.all(jnp.isfinite(feats)))
    print("KERNEL_OK")
</pallas_src>

<mosaic_0001>
module attributes {stable_mosaic.version = 11 : i64} {
  func.func @_mm_affine_kernel(%arg0: i32, %arg1: i32, %arg2: i32, %arg3: memref<512x147xbf16, #tpu.memory_space<vmem>>, %arg4: memref<147x128xbf16, #tpu.memory_space<vmem>>, %arg5: memref<1x128xf32, #tpu.memory_space<vmem>>, %arg6: memref<1x128xf32, #tpu.memory_space<vmem>>, %arg7: memref<512x128xbf16, #tpu.memory_space<vmem>>, %arg8: memref<512x128xf32, #tpu.memory_space<vmem>>) attributes {dimension_semantics = [#tpu.dimension_semantics<parallel>, #tpu.dimension_semantics<parallel>, #tpu.dimension_semantics<arbitrary>], iteration_bounds = array<i64: 1, 1, 1>, scalar_prefetch = 0 : i64, scratch_operands = 1 : i64, tpu.core_type = #tpu.core_type<tc>, window_params = [{transform_indices = @transform_0, window_bounds = array<i64: 512, 147>}, {transform_indices = @transform_1, window_bounds = array<i64: 147, 128>}, {transform_indices = @transform_2, window_bounds = array<i64: 1, 128>}, {transform_indices = @transform_3, window_bounds = array<i64: 1, 128>}, {transform_indices = @transform_4, window_bounds = array<i64: 512, 128>}]} {
    %c0_i32 = arith.constant 0 : i32
    %0 = arith.cmpi eq, %arg2, %c0_i32 : i32
    %1 = arith.extui %0 : i1 to i32
    %c0_i32_0 = arith.constant 0 : i32
    %2 = arith.cmpi ne, %1, %c0_i32_0 : i32
    scf.if %2 {
      %cst_10 = arith.constant 0.000000e+00 : f32
      %12 = vector.broadcast %cst_10 : f32 to vector<512x128xf32>
      %c0_11 = arith.constant 0 : index
      %c0_12 = arith.constant 0 : index
      %13 = vector.load %arg8[%c0_11, %c0_12] : memref<512x128xf32, #tpu.memory_space<vmem>>, vector<512x128xf32>
      tpu.vector_store %arg8[%c0_11, %c0_12], %12 {strides = array<i32>} : memref<512x128xf32, #tpu.memory_space<vmem>>, vector<512x128xf32>,
    } else {
    }
    %c0 = arith.constant 0 : index
    %c0_1 = arith.constant 0 : index
    %3 = vector.load %arg8[%c0, %c0_1] : memref<512x128xf32, #tpu.memory_space<vmem>>, vector<512x128xf32>
    %c0_2 = arith.constant 0 : index
    %c0_3 = arith.constant 0 : index
    %4 = vector.load %arg3[%c0_2, %c0_3] : memref<512x147xbf16, #tpu.memory_space<vmem>>, vector<512x147xbf16>
    %c0_4 = arith.constant 0 : index
    %c0_5 = arith.constant 0 : index
    %5 = vector.load %arg4[%c0_4, %c0_5] : memref<147x128xbf16, #tpu.memory_space<vmem>>, vector<147x128xbf16>
    %cst = arith.constant dense<0.000000e+00> : vector<512x128xf32>
    %6 = tpu.matmul %4, %5, %cst {dimension_numbers = #tpu.dot_dimension_numbers<[1], [0], [0], [1], [0, 0, 1, 1], [], []>} : vector<512x147xbf16>, vector<147x128xbf16>, vector<512x128xf32> -> vector<512x128xf32>
    %7 = arith.addf %3, %6 : vector<512x128xf32>
    %c0_6 = arith.constant 0 : index
    %c0_7 = arith.constant 0 : index
    %8 = vector.load %arg8[%c0_6, %c0_7] : memref<512x128xf32, #tpu.memory_space<vmem>>, vector<512x128xf32>
    tpu.vector_store %arg8[%c0_6, %c0_7], %7 {strides = array<i32>} : memref<512x128xf32, #tpu.memory_space<vmem>>, vector<512x128xf32>,
    %c0_i32_8 = arith.constant 0 : i32
    %9 = arith.cmpi eq, %arg2, %c0_i32_8 : i32
    %10 = arith.extui %9 : i1 to i32
    %c0_i32_9 = arith.constant 0 : i32
    %11 = arith.cmpi ne, %10, %c0_i32_9 : i32
    scf.if %11 {
      %c0_10 = arith.constant 0 : index
      %c0_11 = arith.constant 0 : index
      %12 = vector.load %arg8[%c0_10, %c0_11] : memref<512x128xf32, #tpu.memory_space<vmem>>, vector<512x128xf32>
      %c0_12 = arith.constant 0 : index
      %c0_13 = arith.constant 0 : index
      %13 = vector.load %arg5[%c0_12, %c0_13] : memref<1x128xf32, #tpu.memory_space<vmem>>, vector<1x128xf32>
      %14 = vector.broadcast %13 : vector<1x128xf32> to vector<512x128xf32>
      %15 = arith.mulf %12, %14 : vector<512x128xf32>
      %c0_14 = arith.constant 0 : index
      %c0_15 = arith.constant 0 : index
      %16 = vector.load %arg6[%c0_14, %c0_15] : memref<1x128xf32, #tpu.memory_space<vmem>>, vector<1x128xf32>
      %17 = vector.broadcast %16 : vector<1x128xf32> to vector<512x128xf32>
      %18 = arith.addf %15, %17 : vector<512x128xf32>
      %cst_16 = arith.constant 0.000000e+00 : f32
      %19 = vector.broadcast %cst_16 : f32 to vector<512x128xf32>
      %20 = arith.maximumf %18, %19 : vector<512x128xf32>
      %21 = arith.truncf %20 : vector<512x128xf32> to vector<512x128xbf16>
      %c0_17 = arith.constant 0 : index
      %c0_18 = arith.constant 0 : index
      %22 = vector.load %arg7[%c0_17, %c0_18] : memref<512x128xbf16, #tpu.memory_space<vmem>>, vector<512x128xbf16>
      tpu.vector_store %arg7[%c0_17, %c0_18], %21 {strides = array<i32>} : memref<512x128xbf16, #tpu.memory_space<vmem>>, vector<512x128xbf16>,
    } else {
    }
    return
  }
  func.func @transform_0(%arg0: i32, %arg1: i32, %arg2: i32) -> (i32, i32) {
    %c0_i32 = arith.constant 0 : i32
    return %arg0, %arg2 : i32, i32
  }
  func.func @transform_1(%arg0: i32, %arg1: i32, %arg2: i32) -> (i32, i32) {
    %c0_i32 = arith.constant 0 : i32
    return %arg2, %arg1 : i32, i32
  }
  func.func @transform_2(%arg0: i32, %arg1: i32, %arg2: i32) -> (i32, i32) {
    %c0_i32 = arith.constant 0 : i32
    %c0_i32_0 = arith.constant 0 : i32
    return %c0_i32, %arg1 : i32, i32
  }
  func.func @transform_3(%arg0: i32, %arg1: i32, %arg2: i32) -> (i32, i32) {
    %c0_i32 = arith.constant 0 : i32
    %c0_i32_0 = arith.constant 0 : i32
    return %c0_i32, %arg1 : i32, i32
  }
  func.func @transform_4(%arg0: i32, %arg1: i32, %arg2: i32) -> (i32, i32) {
    %c0_i32 = arith.constant 0 : i32
    return %arg0, %arg1 : i32, i32
  }
}

</mosaic_0001>

<bundles_post_ra>
// kernel: tpu_custom_call.1
= control target key start
LH: loop header
LB: loop body
LE: loop exit
PB: predicated region body
PF: predicated region fallthrough
CT: control target
= control target key end

     0   :  { %v2291_v1 = vmov 0   ;;  %vm579_vm0 = vcmask 154624   ;;  %vm676_vm1 = vcmask 1040384   ;;  %vm677_vm2 = vcmask 1041408   ;;  %s2725_s0 = inlined_call_operand.vmem [shape: bf16[512,147], index: 0, kind: input, shape index: {}]   ;;  %s2726_s1 = inlined_call_operand.vmem [shape: bf16[147,128], index: 1, kind: input, shape index: {}]   ;;  %s2727_s2 = inlined_call_operand.vmem [shape: f32[1,128], index: 2, kind: input, shape index: {}]   ;;  %s2728_s3 = inlined_call_operand.vmem [shape: f32[1,128], index: 3, kind: input, shape index: {}]   ;;  %s2729_s4 = inlined_call_operand.hbm [shape: bf16[512,128], index: 4, kind: output, shape index: {}]  }
   0x1   :  { %v2161_v0 = vld [vmem:[%s2726_s1] sm:$0xff]   ;;  %683 = vmatprep.subr.bf16.mxu0 %v2291_v1  ;;  %2136 = vmatprep.subr.bf16.mxu1 %v2291_v1  ;;  %v2162_v2 = vld [vmem:[%s2726_s1 + $0x8] sm:$0xff]   ;;  %v2163_v3 = vld [vmem:[%s2726_s1 + $0x10] sm:$0xff]   ;;  %v2292_v11 = vmov 65535  }
   0x2   :  { %684 = vmatpush1.bf16.msra.mxu0 %v2161_v0  ;;  %2146 = vmatpush1.bf16.msra.mxu1 %v2161_v0  ;;  %v2164_v4 = vld [vmem:[%s2726_s1 + $0x18] sm:$0xff]   ;;  %v2173_v5 = vld [vmem:[%s2725_s0 + $0x4] ss:$8 sps:$4 sm:$0xff]   ;;  %v2167_v9 = vld [vmem:[%s2726_s1 + $0x30] sm:$0xff]   ;;  %v678_v12 = vsel %vm676_vm1, 4294967295, %v2292_v11 }
   0x3   :  { %685 = vmatprep.subr.bf16.mxu0 %v2291_v1  ;;  %2137 = vmatprep.subr.bf16.mxu1 %v2291_v1  ;;  %v2176_v6 = vld [vmem:[%s2725_s0 + $0x104] ss:$8 sps:$4 sm:$0xff]   ;;  %v2168_v10 = vld [vmem:[%s2726_s1 + $0x38] sm:$0xff]   ;;  %v2170_v14 = vld [vmem:[%s2726_s1 + $0x48] ss:$0 sps:$4 sm:$0x33]  }
   0x4   :  { %1783 = vmatprep.mubr.msk.bf16.mxu0 %vm579_vm0, %v2173_v5  ;;  %v2165_v7 = vld [vmem:[%s2726_s1 + $0x20] sm:$0xff]   ;;  %1799 = vmatprep.mubr.msk.bf16.mxu1 %vm579_vm0, %v2176_v6  ;;  %v2166_v8 = vld [vmem:[%s2726_s1 + $0x28] sm:$0xff]   ;;  %v679_v15 = vsel %vm677_vm2, %v678_v12, 0  ;;  %v2177_v19 = vld [vmem:[%s2725_s0 + $0x14] ss:$8 sps:$4 sm:$0xff]  }
   0x5   :  { %v2169_v13 = vld [vmem:[%s2726_s1 + $0x40] sm:$0xff]   ;;  %v681_v16 = vand.u32 %v2170_v14, %v679_v15  ;;  %v2179_v20 = vld [vmem:[%s2725_s0 + $0x114] ss:$8 sps:$4 sm:$0xff]   ;;  %v2181_v21 = vld [vmem:[%s2725_s0 + $0x10] ss:$8 sps:$4 sm:$0xff]  }
   0x6   :  { %686 = vmatpush1.bf16.msra.mxu0 %v2162_v2  ;;  %2147 = vmatpush1.bf16.msra.mxu1 %v2162_v2  ;;  %v2171_v17 = vld [vmem:[%s2725_s0] ss:$8 sps:$4 sm:$0xff]   ;;  %v2182_v22 = vld [vmem:[%s2725_s0 + $0x110] ss:$8 sps:$4 sm:$0xff]   ;;  %v2183_v23 = vld [vmem:[%s2725_s0 + $0x24] ss:$8 sps:$4 sm:$0xff]  }
   0x7   :  { %687 = vmatprep.subr.bf16.mxu0 %v2291_v1  ;;  %2138 = vmatprep.subr.bf16.mxu1 %v2291_v1  ;;  %v2174_v18 = vld [vmem:[%s2725_s0 + $0x100] ss:$8 sps:$4 sm:$0xff]   ;;  %v2185_v24 = vld [vmem:[%s2725_s0 + $0x124] ss:$8 sps:$4 sm:$0xff]  }
   0xa   :  { %688 = vmatpush1.bf16.msra.mxu0 %v2163_v3  ;;  %2148 = vmatpush1.bf16.msra.mxu1 %v2163_v3 }
   0xb   :  { %689 = vmatprep.subr.bf16.mxu0 %v2291_v1  ;;  %2139 = vmatprep.subr.bf16.mxu1 %v2291_v1 }
   0xe   :  { %690 = vmatpush1.bf16.msra.mxu0 %v2164_v4  ;;  %2149 = vmatpush1.bf16.msra.mxu1 %v2164_v4 }
   0xf   :  { %691 = vmatprep.subr.bf16.mxu0 %v2291_v1  ;;  %2140 = vmatprep.subr.bf16.mxu1 %v2291_v1 }
  0x12   :  { %692 = vmatpush1.bf16.msra.mxu0 %v2165_v7  ;;  %2150 = vmatpush1.bf16.msra.mxu1 %v2165_v7 }
  0x13   :  { %693 = vmatprep.subr.bf16.mxu0 %v2291_v1  ;;  %2141 = vmatprep.subr.bf16.mxu1 %v2291_v1 }
  0x16   :  { %694 = vmatpush1.bf16.msra.mxu0 %v2166_v8  ;;  %2151 = vmatpush1.bf16.msra.mxu1 %v2166_v8 }
  0x17   :  { %695 = vmatprep.subr.bf16.mxu0 %v2291_v1  ;;  %2142 = vmatprep.subr.bf16.mxu1 %v2291_v1 }
  0x1a   :  { %696 = vmatpush1.bf16.msra.mxu0 %v2167_v9  ;;  %2152 = vmatpush1.bf16.msra.mxu1 %v2167_v9 }
  0x1b   :  { %697 = vmatprep.subr.bf16.mxu0 %v2291_v1  ;;  %2143 = vmatprep.subr.bf16.mxu1 %v2291_v1 }
  0x1e   :  { %698 = vmatpush1.bf16.msra.mxu0 %v2168_v10  ;;  %2153 = vmatpush1.bf16.msra.mxu1 %v2168_v10 }
  0x1f   :  { %699 = vmatprep.subr.bf16.mxu0 %v2291_v1  ;;  %2144 = vmatprep.subr.bf16.mxu1 %v2291_v1 }
  0x22   :  { %700 = vmatpush1.bf16.msra.mxu0 %v2169_v13  ;;  %2154 = vmatpush1.bf16.msra.mxu1 %v2169_v13 }
  0x23   :  { %701 = vmatprep.subr.bf16.mxu0 %v2291_v1  ;;  %2145 = vmatprep.subr.bf16.mxu1 %v2291_v1 }
  0x26   :  { %702 = vmatpush1.bf16.msra.mxu0 %v681_v16  ;;  %2155 = vmatpush1.bf16.msra.mxu1 %v681_v16 }
  0x29   :  { %716 = vmatmul.mubr.bf16.vlgmr.msra.gmra.mrb[0].mxu0 %v2171_v17  ;;  %844 = vmatmul.mubr.bf16.vlgmr.msra.gmra.mrb[0].mxu1 %v2174_v18 }
  0x2a   :  { %1784 = vmatprep.mubr.msk.bf16.mxu0 %vm579_vm0, %v2177_v19  ;;  %1800 = vmatprep.mubr.msk.bf16.mxu1 %vm579_vm0, %v2179_v20 }
  0x31   :  { %724 = vmatmul.mubr.bf16.gmra.mrb[4].mxu0 %v2181_v21  ;;  %852 = vmatmul.mubr.bf16.gmra.mrb[4].mxu1 %v2182_v22 }
  0x32   :  { %1785 = vmatprep.mubr.msk.bf16.mxu0 %vm579_vm0, %v2183_v23  ;;  %1801 = vmatprep.mubr.msk.bf16.mxu1 %vm579_vm0, %v2185_v24 }
  0x33   :  { %9 = vsyncpa [#allocation4], 0  ;;  %v2187_v25 = vld [vmem:[%s2725_s0 + $0x20] ss:$8 sps:$4 sm:$0xff]   ;;  %v2189_v27 = vld [vmem:[%s2725_s0 + $0x34] ss:$8 sps:$4 sm:$0xff]  }
  0x34   :  { %v2188_v26 = vld [vmem:[%s2725_s0 + $0x120] ss:$8 sps:$4 sm:$0xff]   ;;  %v2191_v28 = vld [vmem:[%s2725_s0 + $0x134] ss:$8 sps:$4 sm:$0xff]   ;;  %v2193_v29 = vld [vmem:[%s2725_s0 + $0x30] ss:$8 sps:$4 sm:$0xff]  }
  0x35   :  { %v2194_v30 = vld [vmem:[%s2725_s0 + $0x130] ss:$8 sps:$4 sm:$0xff]   ;;  %v2195_v31 = vld [vmem:[%s2725_s0 + $0x44] ss:$8 sps:$4 sm:$0xff]   ;;  %v2199_v33 = vld [vmem:[%s2725_s0 + $0x40] ss:$8 sps:$4 sm:$0xff]  }
  0x36   :  { %v2197_v32 = vld [vmem:[%s2725_s0 + $0x144] ss:$8 sps:$4 sm:$0xff]   ;;  %v2200_v34 = vld [vmem:[%s2725_s0 + $0x140] ss:$8 sps:$4 sm:$0xff]   ;;  %v2201_v35 = vld [vmem:[%s2725_s0 + $0x54] ss:$8 sps:$4 sm:$0xff]  }
  0x37   :  { %v2203_v36 = vld [vmem:[%s2725_s0 + $0x154] ss:$8 sps:$4 sm:$0xff]   ;;  %v2205_v37 = vld [vmem:[%s2725_s0 + $0x50] ss:$8 sps:$4 sm:$0xff]   ;;  %v2207_v39 = vld [vmem:[%s2725_s0 + $0x64] ss:$8 sps:$4 sm:$0xff]  }
  0x38   :  { %v2206_v38 = vld [vmem:[%s2725_s0 + $0x150] ss:$8 sps:$4 sm:$0xff]   ;;  %v2209_v40 = vld [vmem:[%s2725_s0 + $0x164] ss:$8 sps:$4 sm:$0xff]   ;;  %v2211_v41 = vld [vmem:[%s2725_s0 + $0x60] ss:$8 sps:$4 sm:$0xff]  }
  0x39   :  { %732 = vmatmul.mubr.bf16.gmra.mrb[8].mxu0 %v2187_v25  ;;  %860 = vmatmul.mubr.bf16.gmra.mrb[8].mxu1 %v2188_v26  ;;  %v2212_v42 = vld [vmem:[%s2725_s0 + $0x160] ss:$8 sps:$4 sm:$0xff]   ;;  %v2213_v43 = vld [vmem:[%s2725_s0 + $0x74] ss:$8 sps:$4 sm:$0xff]   ;;  %v2217_v45 = vld [vmem:[%s2725_s0 + $0x70] ss:$8 sps:$4 sm:$0xff]  }
  0x3a   :  { %1786 = vmatprep.mubr.msk.bf16.mxu0 %vm579_vm0, %v2189_v27  ;;  %1802 = vmatprep.mubr.msk.bf16.mxu1 %vm579_vm0, %v2191_v28  ;;  %v2215_v44 = vld [vmem:[%s2725_s0 + $0x174] ss:$8 sps:$4 sm:$0xff]   ;;  %v2218_v46 = vld [vmem:[%s2725_s0 + $0x170] ss:$8 sps:$4 sm:$0xff]   ;;  %v2219_v47 = vld [vmem:[%s2725_s0 + $0x84] ss:$8 sps:$4 sm:$0xff]  }
  0x3b   :  { %v2221_v48 = vld [vmem:[%s2725_s0 + $0x184] ss:$8 sps:$4 sm:$0xff]   ;;  %v2223_v49 = vld [vmem:[%s2725_s0 + $0x80] ss:$8 sps:$4 sm:$0xff]   ;;  %v2225_v51 = vld [vmem:[%s2725_s0 + $0x94] ss:$8 sps:$4 sm:$0xff]  }
  0x3c   :  { %v2224_v50 = vld [vmem:[%s2725_s0 + $0x180] ss:$8 sps:$4 sm:$0xff]   ;;  %v2227_v52 = vld [vmem:[%s2725_s0 + $0x194] ss:$8 sps:$4 sm:$0xff]   ;;  %v2229_v53 = vld [vmem:[%s2725_s0 + $0x90] ss:$8 sps:$4 sm:$0xff]  }
  0x3d   :  { %v2230_v54 = vld [vmem:[%s2725_s0 + $0x190] ss:$8 sps:$4 sm:$0xff]   ;;  %v2231_v55 = vld [vmem:[%s2725_s0 + $0xa4] ss:$8 sps:$4 sm:$0xff]   ;;  %v2235_v57 = vld [vmem:[%s2725_s0 + $0xa0] ss:$8 sps:$4 sm:$0xff]  }
  0x3e   :  { %v2233_v56 = vld [vmem:[%s2725_s0 + $0x1a4] ss:$8 sps:$4 sm:$0xff]   ;;  %v2236_v58 = vld [vmem:[%s2725_s0 + $0x1a0] ss:$8 sps:$4 sm:$0xff]   ;;  %v2237_v59 = vld [vmem:[%s2725_s0 + $0xb4] ss:$8 sps:$4 sm:$0xff]  }
  0x3f   :  { %v2239_v60 = vld [vmem:[%s2725_s0 + $0x1b4] ss:$8 sps:$4 sm:$0xff]   ;;  %v2241_v61 = vld [vmem:[%s2725_s0 + $0xb0] ss:$8 sps:$4 sm:$0xff]   ;;  %v2243_v63 = vld [vmem:[%s2725_s0 + $0xc4] ss:$8 sps:$4 sm:$0xff]  }
  0x40   :  { %v2242_v62 = vld [vmem:[%s2725_s0 + $0x1b0] ss:$8 sps:$4 sm:$0xff]   ;;  %v2245_v0 = vld [vmem:[%s2725_s0 + $0x1c4] ss:$8 sps:$4 sm:$0xff]   ;;  %v2247_v1 = vld [vmem:[%s2725_s0 + $0xc0] ss:$8 sps:$4 sm:$0xff]  }
  0x41   :  { %740 = vmatmul.mubr.bf16.gmra.mrb[12].mxu0 %v2193_v29  ;;  %868 = vmatmul.mubr.bf16.gmra.mrb[12].mxu1 %v2194_v30  ;;  %v2248_v2 = vld [vmem:[%s2725_s0 + $0x1c0] ss:$8 sps:$4 sm:$0xff]   ;;  %v2249_v3 = vld [vmem:[%s2725_s0 + $0xd4] ss:$8 sps:$4 sm:$0xff]   ;;  %v2253_v5 = vld [vmem:[%s2725_s0 + $0xd0] ss:$8 sps:$4 sm:$0xff]  }
  0x42   :  { %1787 = vmatprep.mubr.msk.bf16.mxu0 %vm579_vm0, %v2195_v31  ;;  %1803 = vmatprep.mubr.msk.bf16.mxu1 %vm579_vm0, %v2197_v32  ;;  %v2251_v4 = vld [vmem:[%s2725_s0 + $0x1d4] ss:$8 sps:$4 sm:$0xff]   ;;  %v2254_v6 = vld [vmem:[%s2725_s0 + $0x1d0] ss:$8 sps:$4 sm:$0xff]   ;;  %v2255_v7 = vld [vmem:[%s2725_s0 + $0xe4] ss:$8 sps:$4 sm:$0xff]  }
  0x43   :  { %v2257_v8 = vld [vmem:[%s2725_s0 + $0x1e4] ss:$8 sps:$4 sm:$0xff]   ;;  %v2259_v9 = vld [vmem:[%s2725_s0 + $0xe0] ss:$8 sps:$4 sm:$0xff]   ;;  %v2261_v11 = vld [vmem:[%s2725_s0 + $0xf4] ss:$8 sps:$4 sm:$0xff]  }
  0x44   :  { %v2260_v10 = vld [vmem:[%s2725_s0 + $0x1e0] ss:$8 sps:$4 sm:$0xff]   ;;  %v2263_v12 = vld [vmem:[%s2725_s0 + $0x1f4] ss:$8 sps:$4 sm:$0xff]   ;;  %v2265_v13 = vld [vmem:[%s2725_s0 + $0xf0] ss:$8 sps:$4 sm:$0xff]  }
  0x45   :  { %v2266_v14 = vld [vmem:[%s2725_s0 + $0x1f0] ss:$8 sps:$4 sm:$0xff]   ;;  %v2578_v15 = vld [vmem:[%s2727_s2] ss:$0 sm:$0xff]  ;;  %s2293_s0 = smov [#allocation3]  }
  0x46   :  { %v2583_v17 = vld [vmem:[%s2728_s3] ss:$0 sm:$0xff]  ;;  %s1698_s2 = sshll.u32 %s2293_s0, 4  ;;  %s1699_s2 = int_to_ptr.vmem [resolvable:$true] %s1698_s2 }
  0x47   :  { %s2267_s3 = scalar_lea.vmem %s1699_s2, 4096  ;;  %p2272_p1 = scmp.lt.s32.totalorder %s1699_s2, %s1699_s2 }
  0x48   :  { %p2268_p0 = scmp.ne.s32.totalorder %s1699_s2, %s2267_s3  ;;  %p2273_p2 = scmp.lt.s32.totalorder %s2267_s3, %s2267_s3 }
  0x49   :  { %748 = vmatmul.mubr.bf16.gmra.mrb[16].mxu0 %v2199_v33  ;;  %876 = vmatmul.mubr.bf16.gmra.mrb[16].mxu1 %v2200_v34 }
  0x4a   :  { %1788 = vmatprep.mubr.msk.bf16.mxu0 %vm579_vm0, %v2201_v35  ;;  %1804 = vmatprep.mubr.msk.bf16.mxu1 %vm579_vm0, %v2203_v36  ;;  %p2274_p3 = por %p2273_p2, %p2272_p1 }
  0x4c   :  { %p2275_p4 = pnand %p2274_p3, %p2268_p0 }
  0x51   :  { %756 = vmatmul.mubr.bf16.gmra.mrb[20].mxu0 %v2205_v37  ;;  %884 = vmatmul.mubr.bf16.gmra.mrb[20].mxu1 %v2206_v38 }
  0x52   :  { %1789 = vmatprep.mubr.msk.bf16.mxu0 %vm579_vm0, %v2207_v39  ;;  %1805 = vmatprep.mubr.msk.bf16.mxu1 %vm579_vm0, %v2209_v40 }
  0x59   :  { %764 = vmatmul.mubr.bf16.gmra.mrb[24].mxu0 %v2211_v41  ;;  %892 = vmatmul.mubr.bf16.gmra.mrb[24].mxu1 %v2212_v42 }
  0x5a   :  { %1790 = vmatprep.mubr.msk.bf16.mxu0 %vm579_vm0, %v2213_v43  ;;  %1806 = vmatprep.mubr.msk.bf16.mxu1 %vm579_vm0, %v2215_v44 }
  0x61   :  { %772 = vmatmul.mubr.bf16.gmra.mrb[28].mxu0 %v2217_v45  ;;  %900 = vmatmul.mubr.bf16.gmra.mrb[28].mxu1 %v2218_v46 }
  0x62   :  { %1791 = vmatprep.mubr.msk.bf16.mxu0 %vm579_vm0, %v2219_v47  ;;  %1807 = vmatprep.mubr.msk.bf16.mxu1 %vm579_vm0, %v2221_v48 }
  0x69   :  { %780 = vmatmul.mubr.bf16.gmra.mrb[32].mxu0 %v2223_v49  ;;  %908 = vmatmul.mubr.bf16.gmra.mrb[32].mxu1 %v2224_v50 }
  0x6a   :  { %1792 = vmatprep.mubr.msk.bf16.mxu0 %vm579_vm0, %v2225_v51  ;;  %1808 = vmatprep.mubr.msk.bf16.mxu1 %vm579_vm0, %v2227_v52 }
  0x71   :  { %788 = vmatmul.mubr.bf16.gmra.mrb[36].mxu0 %v2229_v53  ;;  %916 = vmatmul.mubr.bf16.gmra.mrb[36].mxu1 %v2230_v54 }
  0x72   :  { %1793 = vmatprep.mubr.msk.bf16.mxu0 %vm579_vm0, %v2231_v55  ;;  %1809 = vmatprep.mubr.msk.bf16.mxu1 %vm579_vm0, %v2233_v56 }
  0x79   :  { %796 = vmatmul.mubr.bf16.gmra.mrb[40].mxu0 %v2235_v57  ;;  %924 = vmatmul.mubr.bf16.gmra.mrb[40].mxu1 %v2236_v58 }
  0x7a   :  { %1794 = vmatprep.mubr.msk.bf16.mxu0 %vm579_vm0, %v2237_v59  ;;  %1810 = vmatprep.mubr.msk.bf16.mxu1 %vm579_vm0, %v2239_v60 }
  0x81   :  { %804 = vmatmul.mubr.bf16.gmra.mrb[44].mxu0 %v2241_v61  ;;  %932 = vmatmul.mubr.bf16.gmra.mrb[44].mxu1 %v2242_v62 }
  0x82   :  { %1795 = vmatprep.mubr.msk.bf16.mxu0 %vm579_vm0, %v2243_v63  ;;  %1811 = vmatprep.mubr.msk.bf16.mxu1 %vm579_vm0, %v2245_v0 }
  0x89   :  { %812 = vmatmul.mubr.bf16.gmra.mrb[48].mxu0 %v2247_v1  ;;  %940 = vmatmul.mubr.bf16.gmra.mrb[48].mxu1 %v2248_v2 }
  0x8a   :  { %1796 = vmatprep.mubr.msk.bf16.mxu0 %vm579_vm0, %v2249_v3  ;;  %1812 = vmatprep.mubr.msk.bf16.mxu1 %vm579_vm0, %v2251_v4 }
  0x91   :  { %820 = vmatmul.mubr.bf16.gmra.mrb[52].mxu0 %v2253_v5  ;;  %948 = vmatmul.mubr.bf16.gmra.mrb[52].mxu1 %v2254_v6 }
  0x92   :  { %1797 = vmatprep.mubr.msk.bf16.mxu0 %vm579_vm0, %v2255_v7  ;;  %1813 = vmatprep.mubr.msk.bf16.mxu1 %vm579_vm0, %v2257_v8 }
  0x99   :  { %828 = vmatmul.mubr.bf16.gmra.mrb[56].mxu0 %v2259_v9  ;;  %956 = vmatmul.mubr.bf16.gmra.mrb[56].mxu1 %v2260_v10 }
  0x9a   :  { %1798 = vmatprep.mubr.msk.bf16.mxu0 %vm579_vm0, %v2261_v11  ;;  %1814 = vmatprep.mubr.msk.bf16.mxu1 %vm579_vm0, %v2263_v12 }
  0xa1   :  { %836 = vmatmul.mubr.bf16.gmra.mrb[60].mxu0 %v2265_v13  ;;  %964 = vmatmul.mubr.bf16.gmra.mrb[60].mxu1 %v2266_v14 }
  0xfc   :  { %v717_v16 = vpop.f32.mrb[0].mxu0  ;;  %v845_v18 = vpop.f32.mrb[0].mxu1 }
  0xfd   :  { %v1174_v19 = vmul.f32 %v2578_v15, %v717_v16  ;;  %v1206_v20 = vmul.f32 %v2578_v15, %v845_v18  ;;  %v719_v21 = vpop.f32.mrb[1].mxu0  ;;  %v847_v22 = vpop.f32.mrb[1].mxu1 }
  0xfe   :  { %v720_v23 = vpop.f32.mrb[2].mxu0  ;;  %v848_v24 = vpop.f32.mrb[2].mxu1 }
  0xff   :  { %v1245_v25 = vadd.f32 %v2583_v17, %v1174_v19  ;;  %v1277_v26 = vadd.f32 %v2583_v17, %v1206_v20  ;;  %v1175_v27 = vmul.f32 %v2578_v15, %v720_v23  ;;  %v1207_v28 = vmul.f32 %v2578_v15, %v848_v24  ;;  %v722_v29 = vpop.f32.mrb[3].mxu0  ;;  %v850_v30 = vpop.f32.mrb[3].mxu1 }
 0x101   :  { %v1246_v31 = vadd.f32 %v2583_v17, %v1175_v27  ;;  %v1278_v32 = vadd.f32 %v2583_v17, %v1207_v28  ;;  %v1309_v33 = vmax.f32 %v1245_v25, 0.0  ;;  %v1341_v34 = vmax.f32 %v1277_v26, 0.0 }
 0x103   :  { %v1310_v35 = vmax.f32 %v1246_v31, 0.0  ;;  %v1342_v36 = vmax.f32 %v1278_v32, 0.0 }
 0x104   :  { %v725_v37 = vpop.f32.mrb[4].mxu0  ;;  %v853_v38 = vpop.f32.mrb[4].mxu1 }
 0x105   :  { %v1948_v39 = vpack.c.bf16 %v1310_v35, %v1309_v33  ;;  %v2028_v40 = vpack.c.bf16 %v1342_v36, %v1341_v34  ;;  %v1176_v41 = vmul.f32 %v2578_v15, %v725_v37  ;;  %v1208_v42 = vmul.f32 %v2578_v15, %v853_v38  ;;  %v727_v43 = vpop.f32.mrb[5].mxu0  ;;  %v855_v44 = vpop.f32.mrb[5].mxu1 }
 0x106   :  { %v728_v45 = vpop.f32.mrb[6].mxu0  ;;  %v856_v46 = vpop.f32.mrb[6].mxu1 }
 0x107   :  { %1949 = vst [vmem:[#allocation3] sm:$0xff] %v1948_v39   ;;  %2120 = vst [vmem:[#allocation3 + $0x80] sm:$0xff] %v2028_v40   ;;  %v1247_v47 = vadd.f32 %v2583_v17, %v1176_v41  ;;  %v1279_v48 = vadd.f32 %v2583_v17, %v1208_v42  ;;  %v1177_v49 = vmul.f32 %v2578_v15, %v728_v45  ;;  %v730_v51 = vpop.f32.mrb[7].mxu0  ;;  %v858_v52 = vpop.f32.mrb[7].mxu1 }
 0x108   :  { %v1209_v50 = vmul.f32 %v2578_v15, %v856_v46 }
 0x109   :  { %v1248_v53 = vadd.f32 %v2583_v17, %v1177_v49  ;;  %v1311_v55 = vmax.f32 %v1247_v47, 0.0  ;;  %v1343_v56 = vmax.f32 %v1279_v48, 0.0 }
 0x10a   :  { %v1280_v54 = vadd.f32 %v2583_v17, %v1209_v50 }
 0x10b   :  { %v1312_v57 = vmax.f32 %v1248_v53, 0.0 }
 0x10c   :  { %v1344_v58 = vmax.f32 %v1280_v54, 0.0  ;;  %v733_v59 = vpop.f32.mrb[8].mxu0  ;;  %v861_v60 = vpop.f32.mrb[8].mxu1 }
 0x10d   :  { %v1953_v61 = vpack.c.bf16 %v1312_v57, %v1311_v55  ;;  %v1178_v63 = vmul.f32 %v2578_v15, %v733_v59  ;;  %v1210_v0 = vmul.f32 %v2578_v15, %v861_v60  ;;  %v735_v1 = vpop.f32.mrb[9].mxu0  ;;  %v863_v2 = vpop.f32.mrb[9].mxu1 }
 0x10e   :  { %v2033_v62 = vpack.c.bf16 %v1344_v58, %v1343_v56  ;;  %v736_v3 = vpop.f32.mrb[10].mxu0  ;;  %v864_v4 = vpop.f32.mrb[10].mxu1 }
 0x10f   :  { %2105 = vst [vmem:[#allocation3 + $0x8] sm:$0xff] %v1953_v61   ;;  %v1249_v5 = vadd.f32 %v2583_v17, %v1178_v63  ;;  %v1281_v6 = vadd.f32 %v2583_v17, %v1210_v0  ;;  %v1179_v7 = vmul.f32 %v2578_v15, %v736_v3  ;;  %v1211_v8 = vmul.f32 %v2578_v15, %v864_v4  ;;  %v738_v9 = vpop.f32.mrb[11].mxu0  ;;  %v866_v10 = vpop.f32.mrb[11].mxu1 }
 0x110   :  { %2121 = vst [vmem:[#allocation3 + $0x88] sm:$0xff] %v2033_v62  }
 0x111   :  { %v1250_v11 = vadd.f32 %v2583_v17, %v1179_v7  ;;  %v1282_v12 = vadd.f32 %v2583_v17, %v1211_v8  ;;  %v1313_v13 = vmax.f32 %v1249_v5, 0.0  ;;  %v1345_v14 = vmax.f32 %v1281_v6, 0.0 }
 0x113   :  { %v1314_v16 = vmax.f32 %v1250_v11, 0.0  ;;  %v1346_v18 = vmax.f32 %v1282_v12, 0.0 }
 0x114   :  { %v741_v19 = vpop.f32.mrb[12].mxu0  ;;  %v869_v20 = vpop.f32.mrb[12].mxu1 }
 0x115   :  { %v1958_v21 = vpack.c.bf16 %v1314_v16, %v1313_v13  ;;  %v2038_v22 = vpack.c.bf16 %v1346_v18, %v1345_v14  ;;  %v1180_v23 = vmul.f32 %v2578_v15, %v741_v19  ;;  %v1212_v24 = vmul.f32 %v2578_v15, %v869_v20  ;;  %v743_v25 = vpop.f32.mrb[13].mxu0  ;;  %v871_v26 = vpop.f32.mrb[13].mxu1 }
 0x116   :  { %v744_v27 = vpop.f32.mrb[14].mxu0  ;;  %v872_v28 = vpop.f32.mrb[14].mxu1 }
 0x117   :  { %2106 = vst [vmem:[#allocation3 + $0x10] sm:$0xff] %v1958_v21   ;;  %2122 = vst [vmem:[#allocation3 + $0x90] sm:$0xff] %v2038_v22   ;;  %v1251_v29 = vadd.f32 %v2583_v17, %v1180_v23  ;;  %v1283_v30 = vadd.f32 %v2583_v17, %v1212_v24  ;;  %v1181_v31 = vmul.f32 %v2578_v15, %v744_v27  ;;  %v746_v33 = vpop.f32.mrb[15].mxu0  ;;  %v874_v34 = vpop.f32.mrb[15].mxu1 }
 0x118   :  { %v1213_v32 = vmul.f32 %v2578_v15, %v872_v28 }
 0x119   :  { %v1252_v35 = vadd.f32 %v2583_v17, %v1181_v31  ;;  %v1315_v37 = vmax.f32 %v1251_v29, 0.0  ;;  %v1347_v38 = vmax.f32 %v1283_v30, 0.0 }
 0x11a   :  { %v1284_v36 = vadd.f32 %v2583_v17, %v1213_v32 }
 0x11b   :  { %v1316_v39 = vmax.f32 %v1252_v35, 0.0 }
 0x11c   :  { %v1348_v40 = vmax.f32 %v1284_v36, 0.0  ;;  %v749_v41 = vpop.f32.mrb[16].mxu0  ;;  %v877_v42 = vpop.f32.mrb[16].mxu1 }
 0x11d   :  { %v1963_v43 = vpack.c.bf16 %v1316_v39, %v1315_v37  ;;  %v1182_v45 = vmul.f32 %v2578_v15, %v749_v41  ;;  %v1214_v46 = vmul.f32 %v2578_v15, %v877_v42  ;;  %v751_v47 = vpop.f32.mrb[17].mxu0  ;;  %v879_v48 = vpop.f32.mrb[17].mxu1 }
 0x11e   :  { %v2043_v44 = vpack.c.bf16 %v1348_v40, %v1347_v38  ;;  %v752_v49 = vpop.f32.mrb[18].mxu0  ;;  %v880_v50 = vpop.f32.mrb[18].mxu1 }
 0x11f   :  { %2107 = vst [vmem:[#allocation3 + $0x18] sm:$0xff] %v1963_v43   ;;  %v1253_v51 = vadd.f32 %v2583_v17, %v1182_v45  ;;  %v1285_v52 = vadd.f32 %v2583_v17, %v1214_v46  ;;  %v1183_v53 = vmul.f32 %v2578_v15, %v752_v49  ;;  %v1215_v54 = vmul.f32 %v2578_v15, %v880_v50  ;;  %v754_v55 = vpop.f32.mrb[19].mxu0  ;;  %v882_v56 = vpop.f32.mrb[19].mxu1 }
 0x120   :  { %2123 = vst [vmem:[#allocation3 + $0x98] sm:$0xff] %v2043_v44  }
 0x121   :  { %v1254_v57 = vadd.f32 %v2583_v17, %v1183_v53  ;;  %v1286_v58 = vadd.f32 %v2583_v17, %v1215_v54  ;;  %v1317_v59 = vmax.f32 %v1253_v51, 0.0  ;;  %v1349_v60 = vmax.f32 %v1285_v52, 0.0 }
 0x123   :  { %v1318_v61 = vmax.f32 %v1254_v57, 0.0  ;;  %v1350_v62 = vmax.f32 %v1286_v58, 0.0 }
 0x124   :  { %v757_v63 = vpop.f32.mrb[20].mxu0  ;;  %v885_v0 = vpop.f32.mrb[20].mxu1 }
 0x125   :  { %v1968_v1 = vpack.c.bf16 %v1318_v61, %v1317_v59  ;;  %v2048_v2 = vpack.c.bf16 %v1350_v62, %v1349_v60  ;;  %v1184_v3 = vmul.f32 %v2578_v15, %v757_v63  ;;  %v1216_v4 = vmul.f32 %v2578_v15, %v885_v0  ;;  %v759_v5 = vpop.f32.mrb[21].mxu0  ;;  %v887_v6 = vpop.f32.mrb[21].mxu1 }
 0x126   :  { %v760_v7 = vpop.f32.mrb[22].mxu0  ;;  %v888_v8 = vpop.f32.mrb[22].mxu1 }
 0x127   :  { %2108 = vst [vmem:[#allocation3 + $0x20] sm:$0xff] %v1968_v1   ;;  %2124 = vst [vmem:[#allocation3 + $0xa0] sm:$0xff] %v2048_v2   ;;  %v1255_v9 = vadd.f32 %v2583_v17, %v1184_v3  ;;  %v1287_v10 = vadd.f32 %v2583_v17, %v1216_v4  ;;  %v1185_v11 = vmul.f32 %v2578_v15, %v760_v7  ;;  %v762_v13 = vpop.f32.mrb[23].mxu0  ;;  %v890_v14 = vpop.f32.mrb[23].mxu1 }
 0x128   :  { %v1217_v12 = vmul.f32 %v2578_v15, %v888_v8 }
 0x129   :  { %v1256_v16 = vadd.f32 %v2583_v17, %v1185_v11  ;;  %v1319_v19 = vmax.f32 %v1255_v9, 0.0  ;;  %v1351_v20 = vmax.f32 %v1287_v10, 0.0 }
 0x12a   :  { %v1288_v18 = vadd.f32 %v2583_v17, %v1217_v12 }
 0x12b   :  { %v1320_v21 = vmax.f32 %v1256_v16, 0.0 }
 0x12c   :  { %v1352_v22 = vmax.f32 %v1288_v18, 0.0  ;;  %v765_v23 = vpop.f32.mrb[24].mxu0  ;;  %v893_v24 = vpop.f32.mrb[24].mxu1 }
 0x12d   :  { %v1973_v25 = vpack.c.bf16 %v1320_v21, %v1319_v19  ;;  %v1186_v27 = vmul.f32 %v2578_v15, %v765_v23  ;;  %v1218_v28 = vmul.f32 %v2578_v15, %v893_v24  ;;  %v767_v29 = vpop.f32.mrb[25].mxu0  ;;  %v895_v30 = vpop.f32.mrb[25].mxu1 }
 0x12e   :  { %v2053_v26 = vpack.c.bf16 %v1352_v22, %v1351_v20  ;;  %v768_v31 = vpop.f32.mrb[26].mxu0  ;;  %v896_v32 = vpop.f32.mrb[26].mxu1 }
 0x12f   :  { %2109 = vst [vmem:[#allocation3 + $0x28] sm:$0xff] %v1973_v25   ;;  %v1257_v33 = vadd.f32 %v2583_v17, %v1186_v27  ;;  %v1289_v34 = vadd.f32 %v2583_v17, %v1218_v28  ;;  %v1187_v35 = vmul.f32 %v2578_v15, %v768_v31  ;;  %v1219_v36 = vmul.f32 %v2578_v15, %v896_v32  ;;  %v770_v37 = vpop.f32.mrb[27].mxu0  ;;  %v898_v38 = vpop.f32.mrb[27].mxu1 }
 0x130   :  { %2125 = vst [vmem:[#allocation3 + $0xa8] sm:$0xff] %v2053_v26  }
 0x131   :  { %v1258_v39 = vadd.f32 %v2583_v17, %v1187_v35  ;;  %v1290_v40 = vadd.f32 %v2583_v17, %v1219_v36  ;;  %v1321_v41 = vmax.f32 %v1257_v33, 0.0  ;;  %v1353_v42 = vmax.f32 %v1289_v34, 0.0 }
 0x133   :  { %v1322_v43 = vmax.f32 %v1258_v39, 0.0  ;;  %v1354_v44 = vmax.f32 %v1290_v40, 0.0 }
 0x134   :  { %v773_v45 = vpop.f32.mrb[28].mxu0  ;;  %v901_v46 = vpop.f32.mrb[28].mxu1 }
 0x135   :  { %v1978_v47 = vpack.c.bf16 %v1322_v43, %v1321_v41  ;;  %v2058_v48 = vpack.c.bf16 %v1354_v44, %v1353_v42  ;;  %v1188_v49 = vmul.f32 %v2578_v15, %v773_v45  ;;  %v1220_v50 = vmul.f32 %v2578_v15, %v901_v46  ;;  %v775_v51 = vpop.f32.mrb[29].mxu0  ;;  %v903_v52 = vpop.f32.mrb[29].mxu1 }
 0x136   :  { %v776_v53 = vpop.f32.mrb[30].mxu0  ;;  %v904_v54 = vpop.f32.mrb[30].mxu1 }
 0x137   :  { %2110 = vst [vmem:[#allocation3 + $0x30] sm:$0xff] %v1978_v47   ;;  %2126 = vst [vmem:[#allocation3 + $0xb0] sm:$0xff] %v2058_v48   ;;  %v1259_v55 = vadd.f32 %v2583_v17, %v1188_v49  ;;  %v1291_v56 = vadd.f32 %v2583_v17, %v1220_v50  ;;  %v1189_v57 = vmul.f32 %v2578_v15, %v776_v53  ;;  %v778_v59 = vpop.f32.mrb[31].mxu0  ;;  %v906_v60 = vpop.f32.mrb[31].mxu1 }
 0x138   :  { %v1221_v58 = vmul.f32 %v2578_v15, %v904_v54 }
 0x139   :  { %v1260_v61 = vadd.f32 %v2583_v17, %v1189_v57  ;;  %v1323_v63 = vmax.f32 %v1259_v55, 0.0  ;;  %v1355_v0 = vmax.f32 %v1291_v56, 0.0 }
 0x13a   :  { %v1292_v62 = vadd.f32 %v2583_v17, %v1221_v58 }
 0x13b   :  { %v1324_v1 = vmax.f32 %v1260_v61, 0.0 }
 0x13c   :  { %v1356_v2 = vmax.f32 %v1292_v62, 0.0  ;;  %v781_v3 = vpop.f32.mrb[32].mxu0  ;;  %v909_v4 = vpop.f32.mrb[32].mxu1 }
 0x13d   :  { %v1983_v5 = vpack.c.bf16 %v1324_v1, %v1323_v63  ;;  %v1190_v7 = vmul.f32 %v2578_v15, %v781_v3  ;;  %v1222_v8 = vmul.f32 %v2578_v15, %v909_v4  ;;  %v783_v9 = vpop.f32.mrb[33].mxu0  ;;  %v911_v10 = vpop.f32.mrb[33].mxu1 }
 0x13e   :  { %v2063_v6 = vpack.c.bf16 %v1356_v2, %v1355_v0  ;;  %v784_v11 = vpop.f32.mrb[34].mxu0  ;;  %v912_v12 = vpop.f32.mrb[34].mxu1 }
 0x13f   :  { %2111 = vst [vmem:[#allocation3 + $0x38] sm:$0xff] %v1983_v5   ;;  %v1261_v13 = vadd.f32 %v2583_v17, %v1190_v7  ;;  %v1293_v14 = vadd.f32 %v2583_v17, %v1222_v8  ;;  %v1191_v16 = vmul.f32 %v2578_v15, %v784_v11  ;;  %v1223_v18 = vmul.f32 %v2578_v15, %v912_v12  ;;  %v786_v19 = vpop.f32.mrb[35].mxu0  ;;  %v914_v20 = vpop.f32.mrb[35].mxu1 }
 0x140   :  { %2127 = vst [vmem:[#allocation3 + $0xb8] sm:$0xff] %v2063_v6  }
 0x141   :  { %v1262_v21 = vadd.f32 %v2583_v17, %v1191_v16  ;;  %v1294_v22 = vadd.f32 %v2583_v17, %v1223_v18  ;;  %v1325_v23 = vmax.f32 %v1261_v13, 0.0  ;;  %v1357_v24 = vmax.f32 %v1293_v14, 0.0 }
 0x143   :  { %v1326_v25 = vmax.f32 %v1262_v21, 0.0  ;;  %v1358_v26 = vmax.f32 %v1294_v22, 0.0 }
 0x144   :  { %v789_v27 = vpop.f32.mrb[36].mxu0  ;;  %v917_v28 = vpop.f32.mrb[36].mxu1 }
 0x145   :  { %v1988_v29 = vpack.c.bf16 %v1326_v25, %v1325_v23  ;;  %v2068_v30 = vpack.c.bf16 %v1358_v26, %v1357_v24  ;;  %v1192_v31 = vmul.f32 %v2578_v15, %v789_v27  ;;  %v1224_v32 = vmul.f32 %v2578_v15, %v917_v28  ;;  %v791_v33 = vpop.f32.mrb[37].mxu0  ;;  %v919_v34 = vpop.f32.mrb[37].mxu1 }
 0x146   :  { %v792_v35 = vpop.f32.mrb[38].mxu0  ;;  %v920_v36 = vpop.f32.mrb[38].mxu1 }
 0x147   :  { %2112 = vst [vmem:[#allocation3 + $0x40] sm:$0xff] %v1988_v29   ;;  %2128 = vst [vmem:[#allocation3 + $0xc0] sm:$0xff] %v2068_v30   ;;  %v1263_v37 = vadd.f32 %v2583_v17, %v1192_v31  ;;  %v1295_v38 = vadd.f32 %v2583_v17, %v1224_v32  ;;  %v1193_v39 = vmul.f32 %v2578_v15, %v792_v35  ;;  %v794_v41 = vpop.f32.mrb[39].mxu0  ;;  %v922_v42 = vpop.f32.mrb[39].mxu1 }
 0x148   :  { %v1225_v40 = vmul.f32 %v2578_v15, %v920_v36 }
 0x149   :  { %v1264_v43 = vadd.f32 %v2583_v17, %v1193_v39  ;;  %v1327_v45 = vmax.f32 %v1263_v37, 0.0  ;;  %v1359_v46 = vmax.f32 %v1295_v38, 0.0 }
 0x14a   :  { %v1296_v44 = vadd.f32 %v2583_v17, %v1225_v40 }
 0x14b   :  { %v1328_v47 = vmax.f32 %v1264_v43, 0.0 }
 0x14c   :  { %v1360_v48 = vmax.f32 %v1296_v44, 0.0  ;;  %v797_v49 = vpop.f32.mrb[40].mxu0  ;;  %v925_v50 = vpop.f32.mrb[40].mxu1 }
 0x14d   :  { %v1993_v51 = vpack.c.bf16 %v1328_v47, %v1327_v45  ;;  %v1194_v53 = vmul.f32 %v2578_v15, %v797_v49  ;;  %v1226_v54 = vmul.f32 %v2578_v15, %v925_v50  ;;  %v799_v55 = vpop.f32.mrb[41].mxu0  ;;  %v927_v56 = vpop.f32.mrb[41].mxu1 }
 0x14e   :  { %v2073_v52 = vpack.c.bf16 %v1360_v48, %v1359_v46  ;;  %v800_v57 = vpop.f32.mrb[42].mxu0  ;;  %v928_v58 = vpop.f32.mrb[42].mxu1 }
 0x14f   :  { %2113 = vst [vmem:[#allocation3 + $0x48] sm:$0xff] %v1993_v51   ;;  %v1265_v59 = vadd.f32 %v2583_v17, %v1194_v53  ;;  %v1297_v60 = vadd.f32 %v2583_v17, %v1226_v54  ;;  %v1195_v61 = vmul.f32 %v2578_v15, %v800_v57  ;;  %v1227_v62 = vmul.f32 %v2578_v15, %v928_v58  ;;  %v802_v63 = vpop.f32.mrb[43].mxu0  ;;  %v930_v0 = vpop.f32.mrb[43].mxu1 }
 0x150   :  { %2129 = vst [vmem:[#allocation3 + $0xc8] sm:$0xff] %v2073_v52  }
 0x151   :  { %v1266_v1 = vadd.f32 %v2583_v17, %v1195_v61  ;;  %v1298_v2 = vadd.f32 %v2583_v17, %v1227_v62  ;;  %v1329_v3 = vmax.f32 %v1265_v59, 0.0  ;;  %v1361_v4 = vmax.f32 %v1297_v60, 0.0 }
 0x153   :  { %v1330_v5 = vmax.f32 %v1266_v1, 0.0  ;;  %v1362_v6 = vmax.f32 %v1298_v2, 0.0 }
 0x154   :  { %v805_v7 = vpop.f32.mrb[44].mxu0  ;;  %v933_v8 = vpop.f32.mrb[44].mxu1 }
 0x155   :  { %v1998_v9 = vpack.c.bf16 %v1330_v5, %v1329_v3  ;;  %v2078_v10 = vpack.c.bf16 %v1362_v6, %v1361_v4  ;;  %v1196_v11 = vmul.f32 %v2578_v15, %v805_v7  ;;  %v1228_v12 = vmul.f32 %v2578_v15, %v933_v8  ;;  %v807_v13 = vpop.f32.mrb[45].mxu0  ;;  %v935_v14 = vpop.f32.mrb[45].mxu1 }
 0x156   :  { %v808_v16 = vpop.f32.mrb[46].mxu0  ;;  %v936_v18 = vpop.f32.mrb[46].mxu1 }
 0x157   :  { %2114 = vst [vmem:[#allocation3 + $0x50] sm:$0xff] %v1998_v9   ;;  %2130 = vst [vmem:[#allocation3 + $0xd0] sm:$0xff] %v2078_v10   ;;  %v1267_v19 = vadd.f32 %v2583_v17, %v1196_v11  ;;  %v1299_v20 = vadd.f32 %v2583_v17, %v1228_v12  ;;  %v1197_v21 = vmul.f32 %v2578_v15, %v808_v16  ;;  %v810_v23 = vpop.f32.mrb[47].mxu0  ;;  %v938_v24 = vpop.f32.mrb[47].mxu1 }
 0x158   :  { %v1229_v22 = vmul.f32 %v2578_v15, %v936_v18 }
 0x159   :  { %v1268_v25 = vadd.f32 %v2583_v17, %v1197_v21  ;;  %v1331_v27 = vmax.f32 %v1267_v19, 0.0  ;;  %v1363_v28 = vmax.f32 %v1299_v20, 0.0 }
 0x15a   :  { %v1300_v26 = vadd.f32 %v2583_v17, %v1229_v22 }
 0x15b   :  { %v1332_v29 = vmax.f32 %v1268_v25, 0.0 }
 0x15c   :  { %v1364_v30 = vmax.f32 %v1300_v26, 0.0  ;;  %v813_v31 = vpop.f32.mrb[48].mxu0  ;;  %v941_v32 = vpop.f32.mrb[48].mxu1 }
 0x15d   :  { %v2003_v33 = vpack.c.bf16 %v1332_v29, %v1331_v27  ;;  %v1198_v35 = vmul.f32 %v2578_v15, %v813_v31  ;;  %v1230_v36 = vmul.f32 %v2578_v15, %v941_v32  ;;  %v815_v37 = vpop.f32.mrb[49].mxu0  ;;  %v943_v38 = vpop.f32.mrb[49].mxu1 }
 0x15e   :  { %v2083_v34 = vpack.c.bf16 %v1364_v30, %v1363_v28  ;;  %v816_v39 = vpop.f32.mrb[50].mxu0  ;;  %v944_v40 = vpop.f32.mrb[50].mxu1 }
 0x15f   :  { %2115 = vst [vmem:[#allocation3 + $0x58] sm:$0xff] %v2003_v33   ;;  %v1269_v41 = vadd.f32 %v2583_v17, %v1198_v35  ;;  %v1301_v42 = vadd.f32 %v2583_v17, %v1230_v36  ;;  %v1199_v43 = vmul.f32 %v2578_v15, %v816_v39  ;;  %v1231_v44 = vmul.f32 %v2578_v15, %v944_v40  ;;  %v818_v45 = vpop.f32.mrb[51].mxu0  ;;  %v946_v46 = vpop.f32.mrb[51].mxu1 }
 0x160   :  { %2131 = vst [vmem:[#allocation3 + $0xd8] sm:$0xff] %v2083_v34  }
 0x161   :  { %v1270_v47 = vadd.f32 %v2583_v17, %v1199_v43  ;;  %v1302_v48 = vadd.f32 %v2583_v17, %v1231_v44  ;;  %v1333_v49 = vmax.f32 %v1269_v41, 0.0  ;;  %v1365_v50 = vmax.f32 %v1301_v42, 0.0 }
 0x163   :  { %v1334_v51 = vmax.f32 %v1270_v47, 0.0  ;;  %v1366_v52 = vmax.f32 %v1302_v48, 0.0 }
 0x164   :  { %v821_v53 = vpop.f32.mrb[52].mxu0  ;;  %v949_v54 = vpop.f32.mrb[52].mxu1 }
 0x165   :  { %v2008_v55 = vpack.c.bf16 %v1334_v51, %v1333_v49  ;;  %v2088_v56 = vpack.c.bf16 %v1366_v52, %v1365_v50  ;;  %v1200_v57 = vmul.f32 %v2578_v15, %v821_v53  ;;  %v1232_v58 = vmul.f32 %v2578_v15, %v949_v54  ;;  %v823_v59 = vpop.f32.mrb[53].mxu0  ;;  %v951_v60 = vpop.f32.mrb[53].mxu1 }
 0x166   :  { %v824_v61 = vpop.f32.mrb[54].mxu0  ;;  %v952_v62 = vpop.f32.mrb[54].mxu1 }
 0x167   :  { %2116 = vst [vmem:[#allocation3 + $0x60] sm:$0xff] %v2008_v55   ;;  %2132 = vst [vmem:[#allocation3 + $0xe0] sm:$0xff] %v2088_v56   ;;  %v1271_v63 = vadd.f32 %v2583_v17, %v1200_v57  ;;  %v1303_v0 = vadd.f32 %v2583_v17, %v1232_v58  ;;  %v1201_v1 = vmul.f32 %v2578_v15, %v824_v61  ;;  %v826_v3 = vpop.f32.mrb[55].mxu0  ;;  %v954_v4 = vpop.f32.mrb[55].mxu1 }
 0x168   :  { %v1233_v2 = vmul.f32 %v2578_v15, %v952_v62 }
 0x169   :  { %v1272_v5 = vadd.f32 %v2583_v17, %v1201_v1  ;;  %v1335_v7 = vmax.f32 %v1271_v63, 0.0  ;;  %v1367_v8 = vmax.f32 %v1303_v0, 0.0 }
 0x16a   :  { %v1304_v6 = vadd.f32 %v2583_v17, %v1233_v2 }
 0x16b   :  { %v1336_v9 = vmax.f32 %v1272_v5, 0.0 }
 0x16c   :  { %v1368_v10 = vmax.f32 %v1304_v6, 0.0  ;;  %v829_v11 = vpop.f32.mrb[56].mxu0  ;;  %v957_v12 = vpop.f32.mrb[56].mxu1 }
 0x16d   :  { %v2013_v13 = vpack.c.bf16 %v1336_v9, %v1335_v7  ;;  %v1202_v16 = vmul.f32 %v2578_v15, %v829_v11  ;;  %v1234_v18 = vmul.f32 %v2578_v15, %v957_v12  ;;  %v831_v19 = vpop.f32.mrb[57].mxu0  ;;  %v959_v20 = vpop.f32.mrb[57].mxu1 }
 0x16e   :  { %v2093_v14 = vpack.c.bf16 %v1368_v10, %v1367_v8  ;;  %v832_v21 = vpop.f32.mrb[58].mxu0  ;;  %v960_v22 = vpop.f32.mrb[58].mxu1 }
 0x16f   :  { %2117 = vst [vmem:[#allocation3 + $0x68] sm:$0xff] %v2013_v13   ;;  %v1273_v23 = vadd.f32 %v2583_v17, %v1202_v16  ;;  %v1305_v24 = vadd.f32 %v2583_v17, %v1234_v18  ;;  %v1203_v25 = vmul.f32 %v2578_v15, %v832_v21  ;;  %v1235_v26 = vmul.f32 %v2578_v15, %v960_v22  ;;  %v834_v27 = vpop.f32.mrb[59].mxu0  ;;  %v962_v28 = vpop.f32.mrb[59].mxu1 }
 0x170   :  { %2133 = vst [vmem:[#allocation3 + $0xe8] sm:$0xff] %v2093_v14  }
 0x171   :  { %v1274_v29 = vadd.f32 %v2583_v17, %v1203_v25  ;;  %v1306_v30 = vadd.f32 %v2583_v17, %v1235_v26  ;;  %v1337_v31 = vmax.f32 %v1273_v23, 0.0  ;;  %v1369_v32 = vmax.f32 %v1305_v24, 0.0 }
 0x173   :  { %v1338_v33 = vmax.f32 %v1274_v29, 0.0  ;;  %v1370_v34 = vmax.f32 %v1306_v30, 0.0 }
 0x174   :  { %v837_v35 = vpop.f32.mrb[60].mxu0  ;;  %v965_v36 = vpop.f32.mrb[60].mxu1 }
 0x175   :  { %v2018_v37 = vpack.c.bf16 %v1338_v33, %v1337_v31  ;;  %v2098_v38 = vpack.c.bf16 %v1370_v34, %v1369_v32  ;;  %v1204_v39 = vmul.f32 %v2578_v15, %v837_v35  ;;  %v1236_v40 = vmul.f32 %v2578_v15, %v965_v36  ;;  %v839_v41 = vpop.f32.mrb[61].mxu0  ;;  %v967_v42 = vpop.f32.mrb[61].mxu1 }
 0x176   :  { %v840_v43 = vpop.f32.mrb[62].mxu0  ;;  %v968_v44 = vpop.f32.mrb[62].mxu1 }
 0x177   :  { %2118 = vst [vmem:[#allocation3 + $0x70] sm:$0xff] %v2018_v37   ;;  %2134 = vst [vmem:[#allocation3 + $0xf0] sm:$0xff] %v2098_v38   ;;  %v1275_v45 = vadd.f32 %v2583_v17, %v1204_v39  ;;  %v1307_v46 = vadd.f32 %v2583_v17, %v1236_v40  ;;  %v1205_v47 = vmul.f32 %v2578_v15, %v840_v43  ;;  %v842_v49 = vpop.f32.mrb[63].mxu0  ;;  %v970_v50 = vpop.f32.mrb[63].mxu1 }
 0x178   :  { %v1237_v48 = vmul.f32 %v2578_v15, %v968_v44 }
 0x179   :  { %v1276_v51 = vadd.f32 %v2583_v17, %v1205_v47  ;;  %v1339_v53 = vmax.f32 %v1275_v45, 0.0  ;;  %v1371_v54 = vmax.f32 %v1307_v46, 0.0 }
 0x17a   :  { %v1308_v52 = vadd.f32 %v2583_v17, %v1237_v48 }
 0x17b   :  { %v1340_v55 = vmax.f32 %v1276_v51, 0.0 }
 0x17c   :  { %v1372_v56 = vmax.f32 %v1308_v52, 0.0 }
 0x17d   :  { %v2023_v57 = vpack.c.bf16 %v1340_v55, %v1339_v53 }
 0x17e   :  { %v2103_v58 = vpack.c.bf16 %v1372_v56, %v1371_v54 }
 0x17f   :  { %2119 = vst [vmem:[#allocation3 + $0x78] sm:$0xff] %v2023_v57  }
 0x180   :  { %2135 = vst [vmem:[#allocation3 + $0xf8] sm:$0xff] %v2103_v58  }
 0x181   :  { %2278 = shalt.err (!%p2275_p4)
}
 0x182   :  { %s2279_s8 = scalar_lea.hbm %s2729_s4, 4096 }
 0x183   :  { %p2280_p5 = scmp.ne.s32.totalorder %s2729_s4, %s2279_s8  ;;  %p2283_p6 = scmp.lt.u32.totalorder %s2279_s8, %s2729_s4 }
 0x185   :  { %p2285_p7 = pnand %p2283_p6, %p2280_p5 }
 0x187   :  { %2288 = shalt.err (!%p2285_p7)
}
 0x188   :  { %s2294_s13 = smov 64   ;;  %s2295_s14 = smov 4  }
 0x189   :  { %1704 = dma.vmem_to_hbm [thread:$0]  %s1699_s2, 4096, %s2729_s4, [#allocation4], %s2294_s13, %s2294_s13, %s2295_s14  }
 0x18a   :  { %2289 = dma.done.wait [#allocation4], 4096  }
 0x18b   :  { %2290 = vsyncadd [#allocation4], 4294963200 }
 0x18c   :  { %1708 = vsyncpa [#allocation4], 1 }

</bundles_post_ra>
